<compile_context>
chip_gen: v6e
topology: v6e:2x2x1
jax: 0.10.0
libtpu: 0.0.40
codegen_flags: <defaults>
</compile_context>

<pallas_src>
import functools

import jax
import jax.numpy as jnp
from jax.experimental import pallas as pl
from jax.experimental.pallas import tpu as pltpu


def _cdiv(a, b):
    return (a + b - 1) // b


def _round_up(x, m):
    return _cdiv(x, m) * m


def _tpu_config():
    """Return (tile_budget_bytes, vmem_limit_bytes, num_tensorcores)."""
    vmem_cap = 64 << 20          # conservative default: v7x per-TC VMEM
    num_tc = 1
    kind = ""
    try:
        kind = jax.devices()[0].device_kind.lower()
    except Exception:
        pass
    try:
        info = pltpu.get_tpu_info()
        cap = int(getattr(info, "vmem_capacity_bytes", 0) or 0)
        if cap:
            vmem_cap = cap
        cores = (getattr(info, "num_cores", None)
                 or getattr(info, "tensorcore_count", None))
        if cores:
            num_tc = int(cores)
    except Exception:
        pass
    if "7" in kind:
        # v7x: 64 MiB per TensorCore (do NOT reuse a 128 MiB v6e budget),
        # 2 TensorCores per chip.
        vmem_cap = min(vmem_cap, 64 << 20)
        num_tc = max(num_tc, 2)
    vmem_cap = max(vmem_cap, 32 << 20)
    budget = int(vmem_cap * 0.65)            # ~83 MiB v5e/v6e, ~42 MiB v7x
    limit = max(min(int(vmem_cap * 0.75), vmem_cap - (12 << 20)),
                budget + (4 << 20))
    return budget, int(limit), num_tc


def _choose_tile_bc(n_bc, per_plane_bytes, budget_bytes, num_tc):
    tile = max(1, int(budget_bytes // max(per_plane_bytes, 1)))
    tile = min(tile, n_bc)
    if num_tc >= 2 and n_bc >= 2:
        # v7x megacore: keep an even, balanced number of grid steps so both
        # TensorCores get work; on 1-TC chips (v5e/v6e) take the full budget.
        steps = max(_cdiv(n_bc, tile), num_tc)
        steps = _cdiv(steps, num_tc) * num_tc
        tile = _cdiv(n_bc, steps)
    # TODO(synk): planes too large for the budget even at tile == 1 (e.g. 4K
    # f32 planes on v7x's 64 MiB VMEM) need intra-plane H tiling with a
    # (kh-1)-row halo via the index_map (plus masking of the last block's
    # halo) and pipeline_mode=pl.Buffered(3) on the input spec.
    return int(tile)


def _box_blur_kernel(xp_ref, o_ref, *, H, kh, kw, inv_area, lane_dense):
    # xp_ref: (tile_bc, Hp, Wp_blk) border-padded planes.  Lanes beyond the
    #         valid padded width (boundary block) hold garbage, but they only
    #         ever feed output columns that the bounded output DMA drops.
    # o_ref : (tile_bc, H, Wo_blk).
    acc_dtype = jnp.float32

    def vread(di):
        r = xp_ref[:, di:di + H, :]
        return r if r.dtype == acc_dtype else r.astype(acc_dtype)

    # Vertical (sublane) pass: kh shifted ref reads -- the row shift rides the
    # vld addressing instead of relayout copies of a preloaded block, and the
    # f32 cast happens per read (no materialized full f32 copy).
    rows = vread(0)
    for di in range(1, kh):
        rows = rows + vread(di)

    # Horizontal (lane) pass.
    wo = o_ref.shape[-1]
    wp = rows.shape[-1]
    if lane_dense:
        # Lane-aligned block: kw-1 XLU rotations (off the VALU/vst path) and a
        # single lane-0-based slice (no relayout), then unmasked dense vst.
        acc = rows
        for dj in range(1, kw):
            acc = acc + pltpu.roll(rows, shift=wp - dj, axis=2)
        acc = acc[:, :, :wo]
    else:
        # Small / ragged width: everything fits in a couple of vregs; plain
        # value slices (and masked stores) are the cheaper option here.
        acc = rows[:, :, 0:wo]
        for dj in range(1, kw):
            acc = acc + rows[:, :, dj:dj + wo]

    # TODO(synk): for kh or kw >= ~7 switch to a running (sliding) sum so the
    # per-element cost is O(1) in kernel size (matters first on v5e).
    o_ref[...] = (acc * inv_area).astype(o_ref.dtype)


def box_blur(x, kernel_size=(3, 3), border_type="reflect"):
    """Equivalent of kornia.filters.BoxBlur(kernel_size, border_type)(x).

    x: (B, C, H, W) array. Returns (B, C, H, W), same dtype.
    Odd kernel sizes only (matches kornia's 'same'-shaped output).
    """
    kh, kw = int(kernel_size[0]), int(kernel_size[1])
    if kh % 2 == 0 or kw % 2 == 0:
        raise NotImplementedError(
            "box_blur: only odd kernel sizes are supported (even sizes need "
            "asymmetric 'same' padding to match kornia).")
    B, C, H, W = x.shape
    pad_h, pad_w = kh // 2, kw // 2

    mode_map = {"reflect": "reflect", "replicate": "edge",
                "circular": "wrap", "constant": "constant"}
    if border_type not in mode_map:
        raise ValueError(f"unsupported border_type: {border_type}")
    jmode = mode_map[border_type]
    if jmode == "reflect" and (pad_h >= H or pad_w >= W):
        raise ValueError(
            "reflect padding requires kernel_size // 2 < spatial size")

    n_bc = B * C
    Hp, Wv = H + kh - 1, W + kw - 1

    # Single border pad (one XLA pass over the input).  No lane-alignment pad
    # and no output crop: both are handled in-kernel via ragged boundary
    # blocks (bounded DMAs touch only the valid columns).
    # TODO(synk): synthesize the reflect/edge/wrap border rows/cols in-kernel
    # from the unpadded input to remove this remaining HBM round trip too.
    xp = jnp.pad(x.reshape(n_bc, H, W),
                 ((0, 0), (pad_h, pad_h), (pad_w, pad_w)), mode=jmode)

    # Lane-density gating: widen blocks to a multiple of 128 only when the
    # overhead is modest (<= 25%); for small W keep exact width + masked vst.
    w_lane = _round_up(W, 128)
    lane_dense = (W % 128 == 0) or ((w_lane - W) * 4 <= W)
    if lane_dense:
        wo_blk = w_lane
        wp_blk = _round_up(wo_blk + kw - 1, 128)   # input block also 128-aligned
    else:
        wo_blk = W
        wp_blk = Wv

    itemsize = jnp.dtype(x.dtype).itemsize
    budget, vmem_limit, num_tc = _tpu_config()
    per_plane = (2 * Hp * wp_blk * itemsize        # double-buffered input block
                 + 2 * H * wo_blk * itemsize       # double-buffered output block
                 + 4 * 4 * H * wp_blk)             # f32 intermediates (rows/acc/...)
    tile_bc = _choose_tile_bc(n_bc, per_plane, budget, num_tc)
    grid = (_cdiv(n_bc, tile_bc),)

    kernel = functools.partial(_box_blur_kernel, H=H, kh=kh, kw=kw,
                               inv_area=1.0 / float(kh * kw),
                               lane_dense=lane_dense)

    cost = pl.CostEstimate(
        flops=(kh + kw - 1) * n_bc * H * W,
        transcendentals=0,
        bytes_accessed=n_bc * (Hp * Wv + H * W) * itemsize,
    )

    out = pl.pallas_call(
        kernel,
        out_shape=jax.ShapeDtypeStruct((n_bc, H, W), x.dtype),
        grid=grid,
        in_specs=[pl.BlockSpec((tile_bc, Hp, wp_blk), lambda i: (i, 0, 0))],
        out_specs=pl.BlockSpec((tile_bc, H, wo_blk), lambda i: (i, 0, 0)),
        compiler_params=pltpu.CompilerParams(
            dimension_semantics=("parallel",),
            vmem_limit_bytes=vmem_limit,
        ),
        cost_estimate=cost,
    )(xp)

    return out.reshape(B, C, H, W)


def _box_blur_reference(x, kernel_size=(3, 3), border_type="reflect"):
    """Pure-JAX reference for correctness check."""
    kh, kw = kernel_size
    pad_h, pad_w = kh // 2, kw // 2
    mode_map = {"reflect": "reflect", "replicate": "edge",
                "circular": "wrap", "constant": "constant"}
    xp = jnp.pad(x.astype(jnp.float32),
                 ((0, 0), (0, 0), (pad_h, pad_h), (pad_w, pad_w)),
                 mode=mode_map[border_type])
    B, C, H, W = x.shape
    acc = jnp.zeros((B, C, H, W), jnp.float32)
    for di in range(kh):
        for dj in range(kw):
            acc = acc + xp[:, :, di:di + H, dj:dj + W]
    return (acc / (kh * kw)).astype(x.dtype)


if __name__ == "__main__":
    key = jax.random.PRNGKey(0)

    # 1) Small-W (exact-width, masked-store) path: the module's example shape.
    x1 = jax.random.uniform(key, (2, 4, 16, 16), dtype=jnp.float32)
    y1 = jax.block_until_ready(box_blur(x1, kernel_size=(3, 3),
                                        border_type="reflect"))
    r1 = _box_blur_reference(x1, (3, 3), "reflect")
    assert y1.shape == x1.shape
    assert jnp.allclose(y1, r1, atol=1e-5, rtol=1e-5)

    # 2) Lane-dense (128-aligned, boundary-block) path with asymmetric kernel
    #    and a different border mode.
    x2 = jax.random.uniform(jax.random.PRNGKey(0), (1, 2, 8, 128),
                            dtype=jnp.float32)
    y2 = jax.block_until_ready(box_blur(x2, kernel_size=(3, 5),
                                        border_type="replicate"))
    r2 = _box_blur_reference(x2, (3, 5), "replicate")
    assert y2.shape == x2.shape
    assert jnp.allclose(y2, r2, atol=1e-5, rtol=1e-5)

    print("KERNEL_OK")
</pallas_src>

<mosaic_0001>
module attributes {stable_mosaic.version = 11 : i64} {
  func.func @_box_blur_kernel(%arg0: i32, %arg1: memref<8x18x18xf32, #tpu.memory_space<vmem>>, %arg2: memref<8x16x16xf32, #tpu.memory_space<vmem>>) attributes {dimension_semantics = [#tpu.dimension_semantics<parallel>], iteration_bounds = array<i64: 1>, scalar_prefetch = 0 : i64, scratch_operands = 0 : i64, tpu.core_type = #tpu.core_type<tc>, window_params = [{transform_indices = @transform_0, window_bounds = array<i64: 8, 18, 18>}, {transform_indices = @transform_1, window_bounds = array<i64: 8, 16, 16>}]} {
    %c0 = arith.constant 0 : index
    %c0_0 = arith.constant 0 : index
    %c0_1 = arith.constant 0 : index
    %0 = vector.load %arg1[%c0, %c0_0, %c0_1] : memref<8x18x18xf32, #tpu.memory_space<vmem>>, vector<8x16x18xf32>
    %c0_2 = arith.constant 0 : index
    %c1 = arith.constant 1 : index
    %c0_3 = arith.constant 0 : index
    %1 = vector.load %arg1[%c0_2, %c1, %c0_3] : memref<8x18x18xf32, #tpu.memory_space<vmem>>, vector<8x16x18xf32>
    %2 = arith.addf %0, %1 : vector<8x16x18xf32>
    %c0_4 = arith.constant 0 : index
    %c2 = arith.constant 2 : index
    %c0_5 = arith.constant 0 : index
    %3 = vector.load %arg1[%c0_4, %c2, %c0_5] : memref<8x18x18xf32, #tpu.memory_space<vmem>>, vector<8x16x18xf32>
    %4 = arith.addf %2, %3 : vector<8x16x18xf32>
    %5 = vector.extract_strided_slice %4 {offsets = [0, 0, 0], sizes = [8, 16, 16], strides = [1, 1, 1]} : vector<8x16x18xf32> to vector<8x16x16xf32>
    %6 = vector.extract_strided_slice %4 {offsets = [0, 0, 1], sizes = [8, 16, 16], strides = [1, 1, 1]} : vector<8x16x18xf32> to vector<8x16x16xf32>
    %7 = arith.addf %5, %6 : vector<8x16x16xf32>
    %8 = vector.extract_strided_slice %4 {offsets = [0, 0, 2], sizes = [8, 16, 16], strides = [1, 1, 1]} : vector<8x16x18xf32> to vector<8x16x16xf32>
    %9 = arith.addf %7, %8 : vector<8x16x16xf32>
    %cst = arith.constant 0.111111112 : f32
    %10 = vector.broadcast %cst : f32 to vector<8x16x16xf32>
    %11 = arith.mulf %9, %10 : vector<8x16x16xf32>
    %c0_6 = arith.constant 0 : index
    %c0_7 = arith.constant 0 : index
    %c0_8 = arith.constant 0 : index
    %12 = vector.load %arg2[%c0_6, %c0_7, %c0_8] : memref<8x16x16xf32, #tpu.memory_space<vmem>>, vector<8x16x16xf32>
    tpu.vector_store %arg2[%c0_6, %c0_7, %c0_8], %11 {strides = array<i32>} : memref<8x16x16xf32, #tpu.memory_space<vmem>>, vector<8x16x16xf32>,
    return
  }
  func.func @transform_0(%arg0: i32) -> (i32, i32, i32) {
    %c0_i32 = arith.constant 0 : i32
    %c0_i32_0 = arith.constant 0 : i32
    %c0_i32_1 = arith.constant 0 : i32
    return %arg0, %c0_i32, %c0_i32_0 : i32, i32, i32
  }
  func.func @transform_1(%arg0: i32) -> (i32, i32, i32) {
    %c0_i32 = arith.constant 0 : i32
    %c0_i32_0 = arith.constant 0 : i32
    %c0_i32_1 = arith.constant 0 : i32
    return %arg0, %c0_i32, %c0_i32_0 : i32, i32, i32
  }
}

</mosaic_0001>

<bundles_post_ra>
// kernel: tpu_custom_call.1
= control target key start
LH: loop header
LB: loop body
LE: loop exit
PB: predicated region body
PF: predicated region fallthrough
CT: control target
= control target key end

     0   :  { %s309_s5 = smov 127   ;;  %s589_s0 = inlined_call_operand.vmem [shape: f32[8,18,18], index: 0, kind: input, shape index: {}]   ;;  %s590_s1 = inlined_call_operand.hbm [shape: f32[8,16,16], index: 1, kind: output, shape index: {}]  }
   0x1   :  { %v11_v0 = vld [vmem:[%s589_s0 + $0x18] sm:$0xff]  ;;  %v9_v4 = vld [vmem:[%s589_s0] sm:$0xff]  ;;  %v10_v13 = vld [vmem:[%s589_s0 + $0x8] sm:$0xff] }
   0x2   :  { %v27_v1 = vld [vmem:[%s589_s0 + $0x19] sm:$0xff]  ;;  %v25_v5 = vld [vmem:[%s589_s0 + $0x1] sm:$0xff]  ;;  %v26_v14 = vld [vmem:[%s589_s0 + $0x9] sm:$0xff] }
   0x3   :  { %v59_v2 = vld [vmem:[%s589_s0 + $0x1a] sm:$0xff]  ;;  %v43_v3 = vadd.f32 %v27_v1, %v11_v0  ;;  %v57_v6 = vld [vmem:[%s589_s0 + $0x2] sm:$0xff]  ;;  %v41_v7 = vadd.f32 %v25_v5, %v9_v4  ;;  %v58_v15 = vld [vmem:[%s589_s0 + $0xa] sm:$0xff]  ;;  %v42_v17 = vadd.f32 %v26_v14, %v10_v13 }
   0x4   :  { %v12_v8 = vld [vmem:[%s589_s0 + $0x20] sm:$0xff]  ;;  %v14_v18 = vld [vmem:[%s589_s0 + $0x38] sm:$0xff]  ;;  %v13_v22 = vld [vmem:[%s589_s0 + $0x30] sm:$0xff] }
   0x5   :  { %v28_v9 = vld [vmem:[%s589_s0 + $0x21] sm:$0xff]  ;;  %v351_v11 = vadd.f32 %v59_v2, %v43_v3  ;;  %v362_v16 = vadd.f32 %v57_v6, %v41_v7  ;;  %v30_v19 = vld [vmem:[%s589_s0 + $0x39] sm:$0xff]  ;;  %v29_v23 = vld [vmem:[%s589_s0 + $0x31] sm:$0xff]  ;;  %v382_v24 = vadd.f32 %v58_v15, %v42_v17 }
   0x6   :  { %v60_v10 = vld [vmem:[%s589_s0 + $0x22] sm:$0xff]  ;;  %v44_v12 = vadd.f32 %v28_v9, %v12_v8  ;;  %v46_v21 = vadd.f32 %v30_v19, %v14_v18  ;;  %v62_v25 = vld [vmem:[%s589_s0 + $0x3a] sm:$0xff]  ;;  %v45_v26 = vadd.f32 %v29_v23, %v13_v22  ;;  %v16_v27 = vld [vmem:[%s589_s0 + $0x50] sm:$0xff] }
   0x7   :  { %109 = vrot.lane.b32.xlu1 %v351_v11, %s309_s5  ;;  %105 = vrot.lane.b32.xlu0 %v362_v16, %s309_s5  ;;  %v32_v28 = vld [vmem:[%s589_s0 + $0x51] sm:$0xff]  ;;  %v15_v30 = vld [vmem:[%s589_s0 + $0x48] sm:$0xff] }
   0x8   :  { %v372_v20 = vadd.f32 %v60_v10, %v44_v12  ;;  %v61_v29 = vld [vmem:[%s589_s0 + $0x32] sm:$0xff]  ;;  %v31_v31 = vld [vmem:[%s589_s0 + $0x49] sm:$0xff]  ;;  %v404_v32 = vadd.f32 %v62_v25, %v46_v21  ;;  %v48_v33 = vadd.f32 %v32_v28, %v16_v27  ;;  %v17_v40 = vld [vmem:[%s589_s0 + $0x60] sm:$0xff] }
   0x9   :  { %v408_v34 = vadd.f32 %v61_v29, %v45_v26  ;;  %v64_v35 = vld [vmem:[%s589_s0 + $0x52] sm:$0xff]  ;;  %v47_v36 = vadd.f32 %v31_v31, %v15_v30  ;;  %v18_v37 = vld [vmem:[%s589_s0 + $0x68] sm:$0xff]  ;;  %v20_v47 = vld [vmem:[%s589_s0 + $0x80] sm:$0xff] }
   0xa   :  { %v34_v38 = vld [vmem:[%s589_s0 + $0x69] sm:$0xff]  ;;  %v33_v41 = vld [vmem:[%s589_s0 + $0x61] sm:$0xff]  ;;  %v430_v42 = vadd.f32 %v64_v35, %v48_v33  ;;  %v19_v50 = vld [vmem:[%s589_s0 + $0x78] sm:$0xff] }
   0xb   :  { %111 = vrot.lane.b32.xlu1 %v372_v20, %s309_s5  ;;  %107 = vrot.lane.b32.xlu0 %v382_v24, %s309_s5  ;;  %v63_v39 = vld [vmem:[%s589_s0 + $0x4a] sm:$0xff]  ;;  %v50_v43 = vadd.f32 %v34_v38, %v18_v37  ;;  %v49_v46 = vadd.f32 %v33_v41, %v17_v40  ;;  %v36_v48 = vld [vmem:[%s589_s0 + $0x81] sm:$0xff] }
   0xc   :  { %v434_v44 = vadd.f32 %v63_v39, %v47_v36  ;;  %v66_v45 = vld [vmem:[%s589_s0 + $0x6a] sm:$0xff]  ;;  %v65_v49 = vld [vmem:[%s589_s0 + $0x62] sm:$0xff]  ;;  %v35_v51 = vld [vmem:[%s589_s0 + $0x79] sm:$0xff] }
   0xf   :  { %115 = vrot.lane.b32.xlu1 %v404_v32, %s309_s5  ;;  %113 = vrot.lane.b32.xlu0 %v408_v34, %s309_s5 }
  0x10   :  { %6 = vsyncpa [#allocation3], 0  ;;  %v456_v52 = vadd.f32 %v66_v45, %v50_v43  ;;  %v52_v53 = vadd.f32 %v36_v48, %v20_v47  ;;  %v460_v54 = vadd.f32 %v65_v49, %v49_v46  ;;  %v68_v55 = vld [vmem:[%s589_s0 + $0x82] sm:$0xff]  ;;  %v51_v56 = vadd.f32 %v35_v51, %v19_v50  ;;  %v22_v57 = vld [vmem:[%s589_s0 + $0x98] sm:$0xff]  ;;  %s310_s18 = smov 126  }
  0x11   :  { %v38_v58 = vld [vmem:[%s589_s0 + $0x99] sm:$0xff]  ;;  %v21_v60 = vld [vmem:[%s589_s0 + $0x90] sm:$0xff]  ;;  %v23_v6 = vld [vmem:[%s589_s0 + $0xa8] sm:$0xff]  ;;  %vm249_vm0 = vcmask 130048  }
  0x12   :  { %v67_v59 = vld [vmem:[%s589_s0 + $0x7a] sm:$0xff]  ;;  %v37_v61 = vld [vmem:[%s589_s0 + $0x91] sm:$0xff]  ;;  %v482_v62 = vadd.f32 %v68_v55, %v52_v53  ;;  %v54_v63 = vadd.f32 %v38_v58, %v22_v57  ;;  %v39_v7 = vld [vmem:[%s589_s0 + $0xa9] sm:$0xff] }
  0x13   :  { %119 = vrot.lane.b32.xlu1 %v430_v42, %s309_s5  ;;  %117 = vrot.lane.b32.xlu0 %v434_v44, %s309_s5  ;;  %v486_v0 = vadd.f32 %v67_v59, %v51_v56  ;;  %v70_v1 = vld [vmem:[%s589_s0 + $0x9a] sm:$0xff]  ;;  %v53_v2 = vadd.f32 %v37_v61, %v21_v60  ;;  %v24_v3 = vld [vmem:[%s589_s0 + $0xb0] sm:$0xff]  ;;  %v55_v13 = vadd.f32 %v39_v7, %v23_v6 }
  0x14   :  { %v40_v4 = vld [vmem:[%s589_s0 + $0xb1] sm:$0xff]  ;;  %v508_v8 = vadd.f32 %v70_v1, %v54_v63 }
  0x15   :  { %v69_v5 = vld [vmem:[%s589_s0 + $0x92] sm:$0xff]  ;;  %v56_v9 = vadd.f32 %v40_v4, %v24_v3  ;;  %v71_v14 = vld [vmem:[%s589_s0 + $0xaa] sm:$0xff] }
  0x16   :  { %v512_v10 = vadd.f32 %v69_v5, %v53_v2  ;;  %v72_v12 = vld [vmem:[%s589_s0 + $0xb2] sm:$0xff]  ;;  %v526_v17 = vadd.f32 %v71_v14, %v55_v13  ;;  %s311_s0 = smov [#allocation2]  }
  0x17   :  { %123 = vrot.lane.b32.xlu1 %v456_v52, %s309_s5  ;;  %121 = vrot.lane.b32.xlu0 %v460_v54, %s309_s5  ;;  %v522_v15 = vadd.f32 %v72_v12, %v56_v9 }
  0x1b   :  { %127 = vrot.lane.b32.xlu1 %v482_v62, %s309_s5  ;;  %125 = vrot.lane.b32.xlu0 %v486_v0, %s309_s5 }
  0x1f   :  { %131 = vrot.lane.b32.xlu1 %v508_v8, %s309_s5  ;;  %129 = vrot.lane.b32.xlu0 %v512_v10, %s309_s5 }
  0x23   :  { %135 = vrot.lane.b32.xlu1 %v522_v15, %s309_s5  ;;  %133 = vrot.lane.b32.xlu0 %v526_v17, %s309_s5  ;;  %s271_s5 = sshll.u32 %s311_s0, 4  ;;  %s272_s5 = int_to_ptr.vmem [resolvable:$true] %s271_s5 }
  0x24   :  { %s287_s19 = scalar_lea.vmem %s272_s5, 2048  ;;  %p292_p1 = scmp.lt.s32.totalorder %s272_s5, %s272_s5 }
  0x25   :  { %p288_p0 = scmp.ne.s32.totalorder %s272_s5, %s287_s19  ;;  %p293_p2 = scmp.lt.s32.totalorder %s287_s19, %s287_s19 }
  0x27   :  { %171 = vrot.lane.b32.xlu1 %v382_v24, %s310_s18  ;;  %169 = vrot.lane.b32.xlu0 %v362_v16, %s310_s18  ;;  %p294_p3 = por %p293_p2, %p292_p1 }
  0x29   :  { %p295_p4 = pnand %p294_p3, %p288_p0 }
  0x2b   :  { %175 = vrot.lane.b32.xlu1 %v372_v20, %s310_s18  ;;  %173 = vrot.lane.b32.xlu0 %v351_v11, %s310_s18 }
  0x2f   :  { %179 = vrot.lane.b32.xlu1 %v404_v32, %s310_s18  ;;  %177 = vrot.lane.b32.xlu0 %v408_v34, %s310_s18 }
  0x33   :  { %183 = vrot.lane.b32.xlu1 %v430_v42, %s310_s18  ;;  %181 = vrot.lane.b32.xlu0 %v434_v44, %s310_s18 }
  0x37   :  { %187 = vrot.lane.b32.xlu1 %v456_v52, %s310_s18  ;;  %185 = vrot.lane.b32.xlu0 %v460_v54, %s310_s18 }
  0x3b   :  { %191 = vrot.lane.b32.xlu1 %v482_v62, %s310_s18  ;;  %189 = vrot.lane.b32.xlu0 %v486_v0, %s310_s18 }
  0x3f   :  { %195 = vrot.lane.b32.xlu1 %v508_v8, %s310_s18  ;;  %193 = vrot.lane.b32.xlu0 %v512_v10, %s310_s18 }
  0x43   :  { %199 = vrot.lane.b32.xlu1 %v522_v15, %s310_s18  ;;  %197 = vrot.lane.b32.xlu0 %v526_v17, %s310_s18 }
  0x79   :  { %v110_v18 = vpop.permute.xlu1 %109  ;;  %v106_v19 = vpop.permute.xlu0 %105 }
  0x7a   :  { %v153_v39 = vadd.f32 %v106_v19, %v362_v16  ;;  %v155_v48 = vadd.f32 %v110_v18, %v351_v11 }
  0x7d   :  { %v112_v21 = vpop.permute.xlu1 %111  ;;  %v108_v22 = vpop.permute.xlu0 %107 }
  0x7e   :  { %v154_v38 = vadd.f32 %v108_v22, %v382_v24  ;;  %v156_v46 = vadd.f32 %v112_v21, %v372_v20 }
  0x81   :  { %v116_v23 = vpop.permute.xlu1 %115  ;;  %v114_v25 = vpop.permute.xlu0 %113 }
  0x82   :  { %v158_v16 = vadd.f32 %v116_v23, %v404_v32  ;;  %v157_v56 = vadd.f32 %v114_v25, %v408_v34 }
  0x85   :  { %v120_v26 = vpop.permute.xlu1 %119  ;;  %v118_v27 = vpop.permute.xlu0 %117 }
  0x86   :  { %v160_v60 = vadd.f32 %v120_v26, %v430_v42  ;;  %v159_v63 = vadd.f32 %v118_v27, %v434_v44 }
  0x89   :  { %v124_v28 = vpop.permute.xlu1 %123  ;;  %v122_v29 = vpop.permute.xlu0 %121 }
  0x8a   :  { %v162_v4 = vadd.f32 %v124_v28, %v456_v52  ;;  %v161_v6 = vadd.f32 %v122_v29, %v460_v54 }
  0x8d   :  { %v128_v30 = vpop.permute.xlu1 %127  ;;  %v126_v31 = vpop.permute.xlu0 %125 }
  0x8e   :  { %v164_v13 = vadd.f32 %v128_v30, %v482_v62  ;;  %v163_v18 = vadd.f32 %v126_v31, %v486_v0 }
  0x91   :  { %v132_v33 = vpop.permute.xlu1 %131  ;;  %v130_v35 = vpop.permute.xlu0 %129 }
  0x92   :  { %v166_v23 = vadd.f32 %v132_v33, %v508_v8  ;;  %v165_v26 = vadd.f32 %v130_v35, %v512_v10 }
  0x95   :  { %v548_v36 = vpop.permute.xlu1 %135  ;;  %v550_v37 = vpop.permute.xlu0 %133 }
  0x96   :  { %v168_v30 = vadd.f32 %v548_v36, %v522_v15 }
  0x99   :  { %v172_v40 = vpop.permute.xlu1 %171  ;;  %v170_v43 = vpop.permute.xlu0 %169 }
  0x9a   :  { %v218_v41 = vadd.f32 %v172_v40, %v154_v38  ;;  %v217_v45 = vadd.f32 %v170_v43, %v153_v39  ;;  %v167_v38 = vadd.f32 %v550_v37, %v526_v17 }
  0x9c   :  { %v234_v47 = vmul.f32 0.11111111, %v218_v41  ;;  %v233_v49 = vmul.f32 0.11111111, %v217_v45 }
  0x9d   :  { %v176_v50 = vpop.permute.xlu1 %175  ;;  %v174_v53 = vpop.permute.xlu0 %173 }
  0x9e   :  { %251 = vst.msk [vmem:[#allocation2 + $0x8] sm:$0xff] %vm249_vm0, %v234_v47  ;;  %v220_v51 = vadd.f32 %v176_v50, %v156_v46  ;;  %250 = vst.msk [vmem:[#allocation2] sm:$0xff] %vm249_vm0, %v233_v49  ;;  %v219_v24 = vadd.f32 %v174_v53, %v155_v48 }
  0xa0   :  { %v236_v55 = vmul.f32 0.11111111, %v220_v51  ;;  %v235_v57 = vmul.f32 0.11111111, %v219_v24 }
  0xa1   :  { %v180_v58 = vpop.permute.xlu1 %179  ;;  %v178_v11 = vpop.permute.xlu0 %177 }
  0xa2   :  { %253 = vst.msk [vmem:[#allocation2 + $0x18] sm:$0xff] %vm249_vm0, %v236_v55  ;;  %v222_v20 = vadd.f32 %v180_v58, %v158_v16  ;;  %252 = vst.msk [vmem:[#allocation2 + $0x10] sm:$0xff] %vm249_vm0, %v235_v57  ;;  %v221_v59 = vadd.f32 %v178_v11, %v157_v56 }
  0xa4   :  { %v238_v61 = vmul.f32 0.11111111, %v222_v20  ;;  %v237_v1 = vmul.f32 0.11111111, %v221_v59 }
  0xa5   :  { %v184_v2 = vpop.permute.xlu1 %183  ;;  %v182_v34 = vpop.permute.xlu0 %181 }
  0xa6   :  { %255 = vst.msk [vmem:[#allocation2 + $0x28] sm:$0xff] %vm249_vm0, %v238_v61  ;;  %v224_v32 = vadd.f32 %v184_v2, %v160_v60  ;;  %254 = vst.msk [vmem:[#allocation2 + $0x20] sm:$0xff] %vm249_vm0, %v237_v1  ;;  %v223_v3 = vadd.f32 %v182_v34, %v159_v63 }
  0xa8   :  { %v240_v5 = vmul.f32 0.11111111, %v224_v32  ;;  %v239_v7 = vmul.f32 0.11111111, %v223_v3 }
  0xa9   :  { %v188_v9 = vpop.permute.xlu1 %187  ;;  %v186_v44 = vpop.permute.xlu0 %185 }
  0xaa   :  { %257 = vst.msk [vmem:[#allocation2 + $0x38] sm:$0xff] %vm249_vm0, %v240_v5  ;;  %v226_v42 = vadd.f32 %v188_v9, %v162_v4  ;;  %256 = vst.msk [vmem:[#allocation2 + $0x30] sm:$0xff] %vm249_vm0, %v239_v7  ;;  %v225_v12 = vadd.f32 %v186_v44, %v161_v6 }
  0xac   :  { %v242_v14 = vmul.f32 0.11111111, %v226_v42  ;;  %v241_v19 = vmul.f32 0.11111111, %v225_v12 }
  0xad   :  { %v192_v21 = vpop.permute.xlu1 %191  ;;  %v190_v54 = vpop.permute.xlu0 %189 }
  0xae   :  { %259 = vst.msk [vmem:[#allocation2 + $0x48] sm:$0xff] %vm249_vm0, %v242_v14  ;;  %v228_v52 = vadd.f32 %v192_v21, %v164_v13  ;;  %258 = vst.msk [vmem:[#allocation2 + $0x40] sm:$0xff] %vm249_vm0, %v241_v19  ;;  %v227_v22 = vadd.f32 %v190_v54, %v163_v18 }
  0xb0   :  { %v244_v25 = vmul.f32 0.11111111, %v228_v52  ;;  %v243_v27 = vmul.f32 0.11111111, %v227_v22 }
  0xb1   :  { %v196_v28 = vpop.permute.xlu1 %195  ;;  %v194_v0 = vpop.permute.xlu0 %193 }
  0xb2   :  { %261 = vst.msk [vmem:[#allocation2 + $0x58] sm:$0xff] %vm249_vm0, %v244_v25  ;;  %v230_v62 = vadd.f32 %v196_v28, %v166_v23  ;;  %260 = vst.msk [vmem:[#allocation2 + $0x50] sm:$0xff] %vm249_vm0, %v243_v27  ;;  %v229_v29 = vadd.f32 %v194_v0, %v165_v26 }
  0xb4   :  { %v246_v31 = vmul.f32 0.11111111, %v230_v62  ;;  %v245_v8 = vmul.f32 0.11111111, %v229_v29 }
  0xb5   :  { %v200_v33 = vpop.permute.xlu1 %199  ;;  %v198_v35 = vpop.permute.xlu0 %197 }
  0xb6   :  { %263 = vst.msk [vmem:[#allocation2 + $0x68] sm:$0xff] %vm249_vm0, %v246_v31  ;;  %v232_v10 = vadd.f32 %v200_v33, %v168_v30  ;;  %262 = vst.msk [vmem:[#allocation2 + $0x60] sm:$0xff] %vm249_vm0, %v245_v8  ;;  %v231_v39 = vadd.f32 %v198_v35, %v167_v38 }
  0xb8   :  { %v248_v40 = vmul.f32 0.11111111, %v232_v10  ;;  %v247_v41 = vmul.f32 0.11111111, %v231_v39 }
  0xba   :  { %265 = vst.msk [vmem:[#allocation2 + $0x78] sm:$0xff] %vm249_vm0, %v248_v40  ;;  %264 = vst.msk [vmem:[#allocation2 + $0x70] sm:$0xff] %vm249_vm0, %v247_v41 }
  0xbb   :  { %298 = shalt.err (!%p295_p4)
}
  0xbc   :  { %s312_s20 = smov 128   ;;  %s313_s21 = smov 8  }
  0xbd   :  { %277 = dma.vmem_to_hbm [thread:$0]  %s272_s5, 2048, %s590_s1, [#allocation3], %s312_s20, %s312_s20, %s313_s21  }
  0xbe   :  { %307 = dma.done.wait [#allocation3], 2048  }
  0xbf   :  { %308 = vsyncadd [#allocation3], 4294965248 }
  0xc0   :  { %281 = vsyncpa [#allocation3], 1 }

</bundles_post_ra>
